<compile_context>
chip_gen: v7x
topology: tpu7x:2x2x1
jax: 0.10.0
libtpu: 0.0.40
codegen_flags: <defaults>
</compile_context>

<pallas_src>
import functools

import jax
import jax.numpy as jnp
from jax import lax
from jax.experimental import pallas as pl
from jax.experimental.pallas import tpu as pltpu

P_DROP = 0.3
KEEP_SCALE = 1.0 / (1.0 - P_DROP)
# keep iff uniform >= p  <=>  bits >= floor(p * 2**32)   (uniform = bits / 2**32)
DROP_THRESHOLD = int(P_DROP * (1 << 32))


def linear_dropout_kernel(x_ref, w_ref, b_ref, bits_ref, o_ref):
    # y = x @ W^T + b, contracting IN vs IN directly (no .T / XLU transpose).
    y = lax.dot_general(
        x_ref[...],
        w_ref[...],
        dimension_numbers=(((1,), (1,)), ((), ())),
        preferred_element_type=jnp.float32,
    ) + b_ref[...]

    # Dropout (training=True): keep with prob 1-p, scale kept values by 1/(1-p).
    # Single integer compare per element on the VPU.
    keep = bits_ref[...] >= jnp.uint32(DROP_THRESHOLD)
    o_ref[...] = jnp.where(
        keep, y * jnp.float32(KEEP_SCALE), jnp.zeros_like(y)
    ).astype(o_ref.dtype)


def _round_up(n, m):
    return ((n + m - 1) // m) * m


@functools.partial(jax.jit, static_argnames=())
def model_forward(x, w, b, key):
    B, IN = x.shape
    OUT = w.shape[0]

    # Sublane/lane-dense padding: batch -> multiple of 8, IN/OUT -> multiple of 128.
    # Zero padding is exact for the matmul; padded rows/cols are sliced off below.
    B_pad = _round_up(B, 8)
    IN_pad = _round_up(IN, 128)
    OUT_pad = _round_up(OUT, 128)

    x_p = jnp.zeros((B_pad, IN_pad), jnp.float32).at[:B, :IN].set(x)
    w_p = jnp.zeros((OUT_pad, IN_pad), jnp.float32).at[:OUT, :IN].set(w)
    b_p = jnp.zeros((1, OUT_pad), jnp.float32).at[0, :OUT].set(b)

    # Dropout random bits from the portable JAX PRNG (one uint32 per output elem).
    bits = jax.random.bits(key, (B_pad, OUT_pad), dtype=jnp.uint32)

    # Tile sizes: minimal lane-dense tiles for the toy shape; grid scales for
    # larger B / OUT.  IN is kept as a single full block (tiny for this layer).
    # TODO(synk): for production-sized IN, add a k grid axis + f32 VMEM accumulator
    # with pl.when(k==0) init / k==last epilogue, and bf16 MXU inputs on v6e/v7x.
    tm, tn = 8, 128
    grid = (B_pad // tm, OUT_pad // tn)

    out_p = pl.pallas_call(
        linear_dropout_kernel,
        out_shape=jax.ShapeDtypeStruct((B_pad, OUT_pad), jnp.float32),
        grid=grid,
        in_specs=[
            pl.BlockSpec((tm, IN_pad), lambda i, j: (i, 0)),  # x tile   (tm, IN)
            pl.BlockSpec((tn, IN_pad), lambda i, j: (j, 0)),  # W tile   (tn, IN)
            pl.BlockSpec((1, tn), lambda i, j: (0, j)),       # bias     (1, tn)
            pl.BlockSpec((tm, tn), lambda i, j: (i, j)),      # random bits
        ],
        out_specs=pl.BlockSpec((tm, tn), lambda i, j: (i, j)),
        compiler_params=pltpu.CompilerParams(
            dimension_semantics=("parallel", "parallel")
        ),
    )(x_p, w_p, b_p, bits)

    return out_p[:B, :OUT]


if __name__ == "__main__":
    key = jax.random.PRNGKey(0)
    kx, kw, kb, kdrop = jax.random.split(key, 4)

    B, IN, OUT = 1, 100, 10
    x = jax.random.normal(kx, (B, IN), dtype=jnp.float32)
    # Deterministic "nn.Linear(100, 10)" params (uniform(-1/sqrt(IN), 1/sqrt(IN)))
    bound = 1.0 / (IN ** 0.5)
    w = jax.random.uniform(kw, (OUT, IN), minval=-bound, maxval=bound, dtype=jnp.float32)
    b = jax.random.uniform(kb, (OUT,), minval=-bound, maxval=bound, dtype=jnp.float32)

    out = model_forward(x, w, b, kdrop)
    jax.block_until_ready(out)
    assert out.shape == (B, OUT), out.shape
    print("KERNEL_OK")
</pallas_src>

<mosaic_0001>
module attributes {stable_mosaic.version = 11 : i64} {
  func.func @linear_dropout_kernel(%arg0: i32, %arg1: i32, %arg2: memref<8x128xf32, #tpu.memory_space<vmem>>, %arg3: memref<128x128xf32, #tpu.memory_space<vmem>>, %arg4: memref<1x128xf32, #tpu.memory_space<vmem>>, %arg5: memref<8x128xi32, #tpu.memory_space<vmem>>, %arg6: memref<8x128xf32, #tpu.memory_space<vmem>>) attributes {dimension_semantics = [#tpu.dimension_semantics<parallel>, #tpu.dimension_semantics<parallel>], iteration_bounds = array<i64: 1, 1>, scalar_prefetch = 0 : i64, scratch_operands = 0 : i64, tpu.core_type = #tpu.core_type<tc>, window_params = [{transform_indices = @transform_0, window_bounds = array<i64: 8, 128>}, {transform_indices = @transform_1, window_bounds = array<i64: 128, 128>}, {transform_indices = @transform_2, window_bounds = array<i64: 1, 128>}, {transform_indices = @transform_3, window_bounds = array<i64: 8, 128>}, {transform_indices = @transform_4, window_bounds = array<i64: 8, 128>}]} {
    %c0 = arith.constant 0 : index
    %c0_0 = arith.constant 0 : index
    %0 = vector.load %arg2[%c0, %c0_0] : memref<8x128xf32, #tpu.memory_space<vmem>>, vector<8x128xf32>
    %c0_1 = arith.constant 0 : index
    %c0_2 = arith.constant 0 : index
    %1 = vector.load %arg3[%c0_1, %c0_2] : memref<128x128xf32, #tpu.memory_space<vmem>>, vector<128x128xf32>
    %cst = arith.constant dense<0.000000e+00> : vector<8x128xf32>
    %2 = tpu.matmul %0, %1, %cst {dimension_numbers = #tpu.dot_dimension_numbers<[1], [1], [0], [0], [0, 0, 1, 0], [], []>} : vector<8x128xf32>, vector<128x128xf32>, vector<8x128xf32> -> vector<8x128xf32>
    %c0_3 = arith.constant 0 : index
    %c0_4 = arith.constant 0 : index
    %3 = vector.load %arg4[%c0_3, %c0_4] : memref<1x128xf32, #tpu.memory_space<vmem>>, vector<1x128xf32>
    %4 = vector.broadcast %3 : vector<1x128xf32> to vector<8x128xf32>
    %5 = arith.addf %2, %4 : vector<8x128xf32>
    %c0_5 = arith.constant 0 : index
    %c0_6 = arith.constant 0 : index
    %6 = vector.load %arg5[%c0_5, %c0_6] : memref<8x128xi32, #tpu.memory_space<vmem>>, vector<8x128xi32>
    %c1288490188_i32 = arith.constant 1288490188 : i32
    %7 = vector.broadcast %c1288490188_i32 : i32 to vector<8x128xi32>
    %8 = arith.cmpi uge, %6, %7 : vector<8x128xi32>
    %cst_7 = arith.constant 1.42857146 : f32
    %9 = vector.broadcast %cst_7 : f32 to vector<8x128xf32>
    %10 = arith.mulf %5, %9 : vector<8x128xf32>
    %cst_8 = arith.constant 0.000000e+00 : f32
    %11 = vector.broadcast %cst_8 : f32 to vector<8x128xf32>
    %12 = arith.select %8, %10, %11 : vector<8x128xi1>, vector<8x128xf32>
    %c0_9 = arith.constant 0 : index
    %c0_10 = arith.constant 0 : index
    %13 = vector.load %arg6[%c0_9, %c0_10] : memref<8x128xf32, #tpu.memory_space<vmem>>, vector<8x128xf32>
    tpu.vector_store %arg6[%c0_9, %c0_10], %12 {strides = array<i32>} : memref<8x128xf32, #tpu.memory_space<vmem>>, vector<8x128xf32>,
    return
  }
  func.func @transform_0(%arg0: i32, %arg1: i32) -> (i32, i32) {
    %c0_i32 = arith.constant 0 : i32
    %c0_i32_0 = arith.constant 0 : i32
    return %arg0, %c0_i32 : i32, i32
  }
  func.func @transform_1(%arg0: i32, %arg1: i32) -> (i32, i32) {
    %c0_i32 = arith.constant 0 : i32
    %c0_i32_0 = arith.constant 0 : i32
    return %arg1, %c0_i32 : i32, i32
  }
  func.func @transform_2(%arg0: i32, %arg1: i32) -> (i32, i32) {
    %c0_i32 = arith.constant 0 : i32
    %c0_i32_0 = arith.constant 0 : i32
    return %c0_i32, %arg1 : i32, i32
  }
  func.func @transform_3(%arg0: i32, %arg1: i32) -> (i32, i32) {
    %c0_i32 = arith.constant 0 : i32
    return %arg0, %arg1 : i32, i32
  }
  func.func @transform_4(%arg0: i32, %arg1: i32) -> (i32, i32) {
    %c0_i32 = arith.constant 0 : i32
    return %arg0, %arg1 : i32, i32
  }
}

</mosaic_0001>

<bundles_post_ra>
// kernel: model_forward.1
= control target key start
LH: loop header
LB: loop body
LE: loop exit
PB: predicated region body
PF: predicated region fallthrough
CT: control target
= control target key end

     0   :  { %v200_v0 = vmov 0.0|0.0   ;;  %vm201_vm0 = vmmov 0   ;;  %v202_v3 = vmov 0.0   ;;  %s288_s1 = inlined_call_operand.vmem [shape: f32[128,128], index: 1, kind: input, shape index: {}]   ;;  %s289_s0 = inlined_call_operand.vmem [shape: f32[8,128], index: 0, kind: input, shape index: {}]   ;;  %s290_s2 = inlined_call_operand.vmem [shape: f32[1,128], index: 2, kind: input, shape index: {}]   ;;  %s291_s3 = inlined_call_operand.vmem [shape: u32[8,128], index: 3, kind: input, shape index: {}]   ;;  %s292_s4 = inlined_call_operand.vmem [shape: f32[8,128], index: 4, kind: output, shape index: {}]  }
   0x1   :  { %173 = vmatprep.subr.bf16.mxu0 %v200_v0  ;;  %v18_v1 = vld [vmem:[%s288_s1] sm:$0xff]  ;;  %v19_v2 = vld [vmem:[%s288_s1 + $0x8] sm:$0xff]  ;;  %170 = vmatprep.mubr.msk.f32.mxu0 %vm201_vm0, %v202_v3  ;;  %v20_v5 = vld [vmem:[%s288_s1 + $0x10] sm:$0xff] }
   0x2   :  { %v174_v4 = vpack.c.bf16 %v19_v2, %v18_v1  ;;  %v21_v6 = vld [vmem:[%s288_s1 + $0x18] sm:$0xff]  ;;  %v22_v8 = vld [vmem:[%s288_s1 + $0x20] sm:$0xff]  ;;  %v23_v9 = vld [vmem:[%s288_s1 + $0x28] sm:$0xff] }
   0x3   :  { %v177_v7 = vpack.c.bf16 %v21_v6, %v20_v5  ;;  %v180_v10 = vpack.c.bf16 %v23_v9, %v22_v8  ;;  %v24_v11 = vld [vmem:[%s288_s1 + $0x30] sm:$0xff]  ;;  %v25_v12 = vld [vmem:[%s288_s1 + $0x38] sm:$0xff]  ;;  %v26_v14 = vld [vmem:[%s288_s1 + $0x40] sm:$0xff] }
   0x4   :  { %175 = vmatpush3.bf16.xpose.msra.mxu0 %v174_v4  ;;  %v183_v13 = vpack.c.bf16 %v25_v12, %v24_v11  ;;  %v27_v15 = vld [vmem:[%s288_s1 + $0x48] sm:$0xff]  ;;  %v28_v17 = vld [vmem:[%s288_s1 + $0x50] sm:$0xff]  ;;  %v29_v18 = vld [vmem:[%s288_s1 + $0x58] sm:$0xff] }
   0x5   :  { %176 = vmatprep.subr.bf16.mxu0 %v200_v0  ;;  %v186_v16 = vpack.c.bf16 %v27_v15, %v26_v14  ;;  %v189_v19 = vpack.c.bf16 %v29_v18, %v28_v17  ;;  %v30_v20 = vld [vmem:[%s288_s1 + $0x60] sm:$0xff]  ;;  %v31_v21 = vld [vmem:[%s288_s1 + $0x68] sm:$0xff]  ;;  %v32_v23 = vld [vmem:[%s288_s1 + $0x70] sm:$0xff] }
   0x6   :  { %v192_v22 = vpack.c.bf16 %v31_v21, %v30_v20  ;;  %v33_v24 = vld [vmem:[%s288_s1 + $0x78] sm:$0xff]  ;;  %v17_v26 = vld [vmem:[%s289_s0] sm:$0xff] }
   0x7   :  { %v195_v25 = vpack.c.bf16 %v33_v24, %v32_v23  ;;  %v120_v27 = vld [vmem:[%s290_s2] ss:$0 sm:$0xff] }
   0x8   :  { %v111_v28 = vld [vmem:[%s291_s3] sm:$0xff] }
   0x9   :  { %vm112_vm1 = vcmp.ge.u32.totalorder %v111_v28, 1288490188 }
   0xc   :  { %178 = vmatpush3.bf16.xpose.msra.mxu0 %v177_v7 }
   0xd   :  { %179 = vmatprep.subr.bf16.mxu0 %v200_v0 }
  0x14   :  { %181 = vmatpush3.bf16.xpose.msra.mxu0 %v180_v10 }
  0x15   :  { %182 = vmatprep.subr.bf16.mxu0 %v200_v0 }
  0x1c   :  { %184 = vmatpush3.bf16.xpose.msra.mxu0 %v183_v13 }
  0x1d   :  { %185 = vmatprep.subr.bf16.mxu0 %v200_v0 }
  0x24   :  { %187 = vmatpush3.bf16.xpose.msra.mxu0 %v186_v16 }
  0x25   :  { %188 = vmatprep.subr.bf16.mxu0 %v200_v0 }
  0x2c   :  { %190 = vmatpush3.bf16.xpose.msra.mxu0 %v189_v19 }
  0x2d   :  { %191 = vmatprep.subr.bf16.mxu0 %v200_v0 }
  0x34   :  { %193 = vmatpush3.bf16.xpose.msra.mxu0 %v192_v22 }
  0x35   :  { %194 = vmatprep.subr.bf16.mxu0 %v200_v0 }
  0x3c   :  { %196 = vmatpush3.bf16.xpose.msra.mxu0 %v195_v25 }
  0x43   :  { %171 = vmatmul.mubr.f32.vlgmr.msra.gmra.mrb[0].mxu0 %v17_v26 }
 0x116   :  { %v107_v29 = vpop.f32.mrb[0].mxu0 }
 0x117   :  { %v108_v30 = vadd.f32 %v120_v27, %v107_v29  ;;  %v172_v31 = vpop.f32.mrb[1].mxu0 }
 0x119   :  { %v113_v32 = vmul.f32 1.4285715, %v108_v30 }
 0x11b   :  { %v114_v33 = vsel %vm112_vm1, %v113_v32, 0.0 }
 0x11c   :  { %115 = vst [vmem:[%s292_s4] sm:$0xff] %v114_v33 }

</bundles_post_ra>
